<compile_context>
chip_gen: v7x
topology: tpu7x:2x2x1
jax: 0.10.0
libtpu: 0.0.40
codegen_flags: <defaults>
</compile_context>

<pallas_src>
import jax
import jax.numpy as jnp
from jax.experimental import pallas as pl
from jax.experimental.pallas import tpu as pltpu


def _leaky_relu(h, slope=0.2):
    # max(h, 0.2*h) == LeakyReLU(0.2) and avoids a compare+select pair.
    return jnp.maximum(h, slope * h)


def discriminator_kernel(x_ref,
                         w1_ref, b1_ref,
                         w2_ref, b2_ref,
                         w3_ref, b3_ref,
                         w4_ref, b4_ref,
                         o_ref):
    # Layer 1: bf16 x bf16 -> f32 accumulator; bias + LeakyReLU in f32.
    h = jnp.dot(x_ref[...], w1_ref[...],
                preferred_element_type=jnp.float32) + b1_ref[...]
    h = _leaky_relu(h)

    # Layer 2
    h = jnp.dot(h.astype(w2_ref.dtype), w2_ref[...],
                preferred_element_type=jnp.float32) + b2_ref[...]
    h = _leaky_relu(h)

    # Layer 3
    h = jnp.dot(h.astype(w3_ref.dtype), w3_ref[...],
                preferred_element_type=jnp.float32) + b3_ref[...]
    h = _leaky_relu(h)

    # Layer 4 (head, no activation)
    h = jnp.dot(h.astype(w4_ref.dtype), w4_ref[...],
                preferred_element_type=jnp.float32) + b4_ref[...]

    o_ref[...] = h.astype(o_ref.dtype)


def discriminator_forward(x, params, *, tile_b=128, out_dtype=jnp.float32):
    """x: [B, im_dim] (bf16 recommended); params: w1..w4 [in,out], b1..b4 [1,out]."""
    B, im_dim = x.shape

    # Pad batch to a multiple of the tile (zeros flow harmlessly through the MLP).
    n_tiles = pl.cdiv(B, tile_b)
    B_pad = n_tiles * tile_b
    if B_pad != B:
        x = jnp.pad(x, ((0, B_pad - B), (0, 0)))

    weights = (params["w1"], params["b1"],
               params["w2"], params["b2"],
               params["w3"], params["b3"],
               params["w4"], params["b4"])

    # x / out: tiled along batch. Weights & biases: full blocks, constant
    # index_map -> loaded once, VMEM-resident across all grid steps.
    x_spec = pl.BlockSpec((tile_b, im_dim), lambda i: (i, 0))
    const_specs = [pl.BlockSpec(w.shape, lambda i: (0, 0)) for w in weights]
    out_spec = pl.BlockSpec((tile_b, 1), lambda i: (i, 0))

    dims = [params["w1"].shape[0], params["w1"].shape[1],
            params["w2"].shape[1], params["w3"].shape[1], params["w4"].shape[1]]
    flops = 2 * B_pad * sum(d_in * d_out for d_in, d_out in zip(dims[:-1], dims[1:]))
    bytes_accessed = (x.size * x.dtype.itemsize
                      + B_pad * 1 * jnp.dtype(out_dtype).itemsize
                      + sum(w.size * w.dtype.itemsize for w in weights))

    out = pl.pallas_call(
        discriminator_kernel,
        out_shape=jax.ShapeDtypeStruct((B_pad, 1), out_dtype),
        grid=(n_tiles,),
        in_specs=[x_spec] + const_specs,
        out_specs=out_spec,
        compiler_params=pltpu.CompilerParams(
            dimension_semantics=("parallel",)),
        cost_estimate=pl.CostEstimate(
            flops=flops, transcendentals=0, bytes_accessed=bytes_accessed),
    )(x, *weights)

    return out[:B]


def init_params(key, im_dim, hidden_dim,
                weight_dtype=jnp.bfloat16, bias_dtype=jnp.float32):
    """Deterministic init matching nn.Linear default (uniform +-1/sqrt(fan_in))."""
    dims = [im_dim, hidden_dim * 4, hidden_dim * 2, hidden_dim, 1]
    params = {}
    keys = jax.random.split(key, 2 * (len(dims) - 1))
    for i, (d_in, d_out) in enumerate(zip(dims[:-1], dims[1:])):
        bound = 1.0 / (d_in ** 0.5)
        wk, bk = keys[2 * i], keys[2 * i + 1]
        params[f"w{i+1}"] = jax.random.uniform(
            wk, (d_in, d_out), jnp.float32,
            minval=-bound, maxval=bound).astype(weight_dtype)
        params[f"b{i+1}"] = jax.random.uniform(
            bk, (1, d_out), jnp.float32,
            minval=-bound, maxval=bound).astype(bias_dtype)
    return params


def discriminator_reference(x, params):
    """Pure-JAX reference mimicking the kernel's precision (bf16 ops, f32 acc)."""
    h = x.astype(jnp.float32)
    for i in range(1, 4):
        h = h @ params[f"w{i}"].astype(jnp.float32) + params[f"b{i}"].astype(jnp.float32)
        h = _leaky_relu(h)
        h = h.astype(jnp.bfloat16).astype(jnp.float32)  # mimic inter-layer downcast
    return h @ params["w4"].astype(jnp.float32) + params["b4"].astype(jnp.float32)


if __name__ == "__main__":
    # Small shapes consistent with the module: im_dim=256, hidden_dim=32.
    # Batch 256 with TILE_B=128 -> 2 grid steps (exercises tiling/pipelining).
    B, IM_DIM, HIDDEN, TILE_B = 256, 256, 32, 128

    key = jax.random.PRNGKey(0)
    pkey, xkey = jax.random.split(key)
    params = init_params(pkey, IM_DIM, HIDDEN)
    x = jax.random.normal(xkey, (B, IM_DIM), jnp.float32).astype(jnp.bfloat16)

    out = discriminator_forward(x, params, tile_b=TILE_B)
    out = jax.block_until_ready(out)

    ref = discriminator_reference(x, params)
    assert out.shape == (B, 1), out.shape
    assert jnp.allclose(out, ref, atol=1e-2, rtol=1e-2), "mismatch vs reference"

    print("KERNEL_OK")
</pallas_src>

<mosaic_0001>
module attributes {stable_mosaic.version = 11 : i64} {
  func.func @discriminator_kernel(%arg0: i32, %arg1: memref<128x256xbf16, #tpu.memory_space<vmem>>, %arg2: memref<256x128xbf16, #tpu.memory_space<vmem>>, %arg3: memref<1x128xf32, #tpu.memory_space<vmem>>, %arg4: memref<128x64xbf16, #tpu.memory_space<vmem>>, %arg5: memref<1x64xf32, #tpu.memory_space<vmem>>, %arg6: memref<64x32xbf16, #tpu.memory_space<vmem>>, %arg7: memref<1x32xf32, #tpu.memory_space<vmem>>, %arg8: memref<32x1xbf16, #tpu.memory_space<vmem>>, %arg9: memref<1x1xf32, #tpu.memory_space<vmem>>, %arg10: memref<128x1xf32, #tpu.memory_space<vmem>>) attributes {dimension_semantics = [#tpu.dimension_semantics<parallel>], iteration_bounds = array<i64: 2>, scalar_prefetch = 0 : i64, scratch_operands = 0 : i64, tpu.core_type = #tpu.core_type<tc>, window_params = [{transform_indices = @transform_0, window_bounds = array<i64: 128, 256>}, {pipeline_mode = #tpu.pipeline_mode<synchronous>, transform_indices = @transform_1, window_bounds = array<i64: 256, 128>}, {pipeline_mode = #tpu.pipeline_mode<synchronous>, transform_indices = @transform_2, window_bounds = array<i64: 1, 128>}, {pipeline_mode = #tpu.pipeline_mode<synchronous>, transform_indices = @transform_3, window_bounds = array<i64: 128, 64>}, {pipeline_mode = #tpu.pipeline_mode<synchronous>, transform_indices = @transform_4, window_bounds = array<i64: 1, 64>}, {pipeline_mode = #tpu.pipeline_mode<synchronous>, transform_indices = @transform_5, window_bounds = array<i64: 64, 32>}, {pipeline_mode = #tpu.pipeline_mode<synchronous>, transform_indices = @transform_6, window_bounds = array<i64: 1, 32>}, {pipeline_mode = #tpu.pipeline_mode<synchronous>, transform_indices = @transform_7, window_bounds = array<i64: 32, 1>}, {pipeline_mode = #tpu.pipeline_mode<synchronous>, transform_indices = @transform_8, window_bounds = array<i64: 1, 1>}, {transform_indices = @transform_9, window_bounds = array<i64: 128, 1>}]} {
    %c0 = arith.constant 0 : index
    %c0_0 = arith.constant 0 : index
    %0 = vector.load %arg1[%c0, %c0_0] : memref<128x256xbf16, #tpu.memory_space<vmem>>, vector<128x256xbf16>
    %c0_1 = arith.constant 0 : index
    %c0_2 = arith.constant 0 : index
    %1 = vector.load %arg2[%c0_1, %c0_2] : memref<256x128xbf16, #tpu.memory_space<vmem>>, vector<256x128xbf16>
    %cst = arith.constant dense<0.000000e+00> : vector<128x128xf32>
    %2 = tpu.matmul %0, %1, %cst {dimension_numbers = #tpu.dot_dimension_numbers<[1], [0], [0], [1], [0, 0, 1, 1], [], []>} : vector<128x256xbf16>, vector<256x128xbf16>, vector<128x128xf32> -> vector<128x128xf32>
    %c0_3 = arith.constant 0 : index
    %c0_4 = arith.constant 0 : index
    %3 = vector.load %arg3[%c0_3, %c0_4] : memref<1x128xf32, #tpu.memory_space<vmem>>, vector<1x128xf32>
    %4 = vector.broadcast %3 : vector<1x128xf32> to vector<128x128xf32>
    %5 = arith.addf %2, %4 : vector<128x128xf32>
    %cst_5 = arith.constant 2.000000e-01 : f32
    %6 = vector.broadcast %cst_5 : f32 to vector<128x128xf32>
    %7 = arith.mulf %6, %5 : vector<128x128xf32>
    %8 = arith.maximumf %5, %7 : vector<128x128xf32>
    %9 = arith.truncf %8 : vector<128x128xf32> to vector<128x128xbf16>
    %c0_6 = arith.constant 0 : index
    %c0_7 = arith.constant 0 : index
    %10 = vector.load %arg4[%c0_6, %c0_7] : memref<128x64xbf16, #tpu.memory_space<vmem>>, vector<128x64xbf16>
    %cst_8 = arith.constant dense<0.000000e+00> : vector<128x64xf32>
    %11 = tpu.matmul %9, %10, %cst_8 {dimension_numbers = #tpu.dot_dimension_numbers<[1], [0], [0], [1], [0, 0, 1, 1], [], []>} : vector<128x128xbf16>, vector<128x64xbf16>, vector<128x64xf32> -> vector<128x64xf32>
    %c0_9 = arith.constant 0 : index
    %c0_10 = arith.constant 0 : index
    %12 = vector.load %arg5[%c0_9, %c0_10] : memref<1x64xf32, #tpu.memory_space<vmem>>, vector<1x64xf32>
    %13 = vector.broadcast %12 : vector<1x64xf32> to vector<128x64xf32>
    %14 = arith.addf %11, %13 : vector<128x64xf32>
    %cst_11 = arith.constant 2.000000e-01 : f32
    %15 = vector.broadcast %cst_11 : f32 to vector<128x64xf32>
    %16 = arith.mulf %15, %14 : vector<128x64xf32>
    %17 = arith.maximumf %14, %16 : vector<128x64xf32>
    %18 = arith.truncf %17 : vector<128x64xf32> to vector<128x64xbf16>
    %c0_12 = arith.constant 0 : index
    %c0_13 = arith.constant 0 : index
    %19 = vector.load %arg6[%c0_12, %c0_13] : memref<64x32xbf16, #tpu.memory_space<vmem>>, vector<64x32xbf16>
    %cst_14 = arith.constant dense<0.000000e+00> : vector<128x32xf32>
    %20 = tpu.matmul %18, %19, %cst_14 {dimension_numbers = #tpu.dot_dimension_numbers<[1], [0], [0], [1], [0, 0, 1, 1], [], []>} : vector<128x64xbf16>, vector<64x32xbf16>, vector<128x32xf32> -> vector<128x32xf32>
    %c0_15 = arith.constant 0 : index
    %c0_16 = arith.constant 0 : index
    %21 = vector.load %arg7[%c0_15, %c0_16] : memref<1x32xf32, #tpu.memory_space<vmem>>, vector<1x32xf32>
    %22 = vector.broadcast %21 : vector<1x32xf32> to vector<128x32xf32>
    %23 = arith.addf %20, %22 : vector<128x32xf32>
    %cst_17 = arith.constant 2.000000e-01 : f32
    %24 = vector.broadcast %cst_17 : f32 to vector<128x32xf32>
    %25 = arith.mulf %24, %23 : vector<128x32xf32>
    %26 = arith.maximumf %23, %25 : vector<128x32xf32>
    %27 = arith.truncf %26 : vector<128x32xf32> to vector<128x32xbf16>
    %c0_18 = arith.constant 0 : index
    %c0_19 = arith.constant 0 : index
    %28 = vector.load %arg8[%c0_18, %c0_19] : memref<32x1xbf16, #tpu.memory_space<vmem>>, vector<32x1xbf16>
    %cst_20 = arith.constant dense<0.000000e+00> : vector<128x1xf32>
    %29 = tpu.matmul %27, %28, %cst_20 {dimension_numbers = #tpu.dot_dimension_numbers<[1], [0], [0], [1], [0, 0, 1, 1], [], []>} : vector<128x32xbf16>, vector<32x1xbf16>, vector<128x1xf32> -> vector<128x1xf32>
    %c0_21 = arith.constant 0 : index
    %c0_22 = arith.constant 0 : index
    %30 = vector.load %arg9[%c0_21, %c0_22] : memref<1x1xf32, #tpu.memory_space<vmem>>, vector<1x1xf32>
    %31 = vector.broadcast %30 : vector<1x1xf32> to vector<128x1xf32>
    %32 = arith.addf %29, %31 : vector<128x1xf32>
    %c0_23 = arith.constant 0 : index
    %c0_24 = arith.constant 0 : index
    %33 = vector.load %arg10[%c0_23, %c0_24] : memref<128x1xf32, #tpu.memory_space<vmem>>, vector<128x1xf32>
    tpu.vector_store %arg10[%c0_23, %c0_24], %32 {strides = array<i32>} : memref<128x1xf32, #tpu.memory_space<vmem>>, vector<128x1xf32>,
    return
  }
  func.func @transform_0(%arg0: i32) -> (i32, i32) {
    %c0_i32 = arith.constant 0 : i32
    %c0_i32_0 = arith.constant 0 : i32
    return %arg0, %c0_i32 : i32, i32
  }
  func.func @transform_1(%arg0: i32) -> (i32, i32) {
    %c0_i32 = arith.constant 0 : i32
    %c0_i32_0 = arith.constant 0 : i32
    %c0_i32_1 = arith.constant 0 : i32
    return %c0_i32, %c0_i32_0 : i32, i32
  }
  func.func @transform_2(%arg0: i32) -> (i32, i32) {
    %c0_i32 = arith.constant 0 : i32
    %c0_i32_0 = arith.constant 0 : i32
    %c0_i32_1 = arith.constant 0 : i32
    return %c0_i32, %c0_i32_0 : i32, i32
  }
  func.func @transform_3(%arg0: i32) -> (i32, i32) {
    %c0_i32 = arith.constant 0 : i32
    %c0_i32_0 = arith.constant 0 : i32
    %c0_i32_1 = arith.constant 0 : i32
    return %c0_i32, %c0_i32_0 : i32, i32
  }
  func.func @transform_4(%arg0: i32) -> (i32, i32) {
    %c0_i32 = arith.constant 0 : i32
    %c0_i32_0 = arith.constant 0 : i32
    %c0_i32_1 = arith.constant 0 : i32
    return %c0_i32, %c0_i32_0 : i32, i32
  }
  func.func @transform_5(%arg0: i32) -> (i32, i32) {
    %c0_i32 = arith.constant 0 : i32
    %c0_i32_0 = arith.constant 0 : i32
    %c0_i32_1 = arith.constant 0 : i32
    return %c0_i32, %c0_i32_0 : i32, i32
  }
  func.func @transform_6(%arg0: i32) -> (i32, i32) {
    %c0_i32 = arith.constant 0 : i32
    %c0_i32_0 = arith.constant 0 : i32
    %c0_i32_1 = arith.constant 0 : i32
    return %c0_i32, %c0_i32_0 : i32, i32
  }
  func.func @transform_7(%arg0: i32) -> (i32, i32) {
    %c0_i32 = arith.constant 0 : i32
    %c0_i32_0 = arith.constant 0 : i32
    %c0_i32_1 = arith.constant 0 : i32
    return %c0_i32, %c0_i32_0 : i32, i32
  }
  func.func @transform_8(%arg0: i32) -> (i32, i32) {
    %c0_i32 = arith.constant 0 : i32
    %c0_i32_0 = arith.constant 0 : i32
    %c0_i32_1 = arith.constant 0 : i32
    return %c0_i32, %c0_i32_0 : i32, i32
  }
  func.func @transform_9(%arg0: i32) -> (i32, i32) {
    %c0_i32 = arith.constant 0 : i32
    %c0_i32_0 = arith.constant 0 : i32
    return %arg0, %c0_i32 : i32, i32
  }
}

</mosaic_0001>

<bundles_post_ra>
// kernel: tpu_custom_call.1
= control target key start
LH: loop header
LB: loop body
LE: loop exit
PB: predicated region body
PF: predicated region fallthrough
CT: control target
= control target key end

     0   :  { %s2284_s0 = inlined_call_operand.hbm [shape: bf16[256,256], index: 0, kind: input, shape index: {}]   ;;  %s2285_s1 = inlined_call_operand.vmem [shape: bf16[256,128], index: 1, kind: input, shape index: {}]   ;;  %s2286_s2 = inlined_call_operand.hbm [shape: f32[1,128], index: 2, kind: input, shape index: {}]   ;;  %s2287_s3 = inlined_call_operand.vmem [shape: bf16[128,64], index: 3, kind: input, shape index: {}]   ;;  %s2288_s4 = inlined_call_operand.vmem [shape: f32[1,64], index: 4, kind: input, shape index: {}]   ;;  %s2289_s5 = inlined_call_operand.vmem [shape: bf16[64,32], index: 5, kind: input, shape index: {}]   ;;  %s2290_s6 = inlined_call_operand.vmem [shape: f32[1,32], index: 6, kind: input, shape index: {}]   ;;  %s2291_s7 = inlined_call_operand.vmem [shape: bf16[32,1], index: 7, kind: input, shape index: {}]   ;;  %s2292_s8 = inlined_call_operand.<no memory space> [shape: f32[1,1], index: 8, kind: input, shape index: {}]   ;;  %s2293_s9 = inlined_call_operand.vmem [shape: f32[256,1], index: 9, kind: output, shape index: {}]  }
   0x1   :  { %v14_v0 = vstv %s2292_s8 }
   0x2   :  { %15 = vst [vmem:[#allocation2] sm:$0x1] %v14_v0 }
   0x3   :  { %16 = vsyncpa [#allocation4], 0 }
   0x4   :  { %18 = vsyncpa [#allocation4 + $0x1], 0 }
   0x5   :  { %19 = vsyncpa [#allocation6], 0  ;;  %s1915_s11 = smov 0   ;;  %s1917_s12 = smov 0  }
   0x6   :  { %s1919_s13 = smov 0   ;;  %s1921_s14 = smov 0  }
   0x7 LB: > { %s1388_s8 = sadd.s32 4294967295, %s1856_s14   ;;  %s1935_s15 = sadd.s32 1, %s1856_s14   ;;  %s1856_s14 = sphi %s1921_s14, %s2312_s14   ;;  %s1852_s13 = sphi %s1919_s13, %s2311_s13   ;;  %s1848_s12 = sphi %s1917_s12, %s2310_s12   ;;  %s1844_s11 = sphi %s1915_s11, %s2309_s11  }
   0x8   : > { %s29_s16 = ssub.s32 %s1856_s14, %s1935_s15  ;;  %s32_s17 = sadd.s32 1, %s1852_s13 }
   0x9   : > { %p30_p0 = scmp.eq.s32.totalorder %s29_s16, 0  ;;  %p39_p1 = scmp.ne.s32.totalorder %s1852_s13, %s1848_s12 }
   0xa   : > { %p40_p2 = scmp.eq.s32.totalorder %s1856_s14, 0  ;;  %p45_p3 = scmp.ne.s32.totalorder %s1848_s12, %s1844_s11 }
   0xb   : > { %s1945_s18 = scalar_select %p30_p0, %s1852_s13, %s32_s17  }
   0xc   : > { %p1947_p4 = por %p40_p2, %p39_p1  ;;  %p1953_p5 = scmp.eq.s32.totalorder %s1388_s8, 0 }
   0xd   : > { %p1390_p6 = scmp.ge.s32.totalorder %s1856_s14, 1  ;;  %p250_p7 = scmp.lt.s32.totalorder %s1856_s14, 3 }
   0xe   : > { %s2300_s20 = scalar_select %p1953_p5, 1, 0 }
   0xf   : > { %p1961_p8 = por %p1953_p5, %p45_p3  ;;  %p1965_p9 = pnand %p1390_p6, %p250_p7 }
  0x10   : > { %s1858_s23 = smov [#allocation5]   ;;  %p1669_p11 = scmp.lt.s32.totalorder %s1856_s14, 2 }
  0x11   : > { %s2301_s21 = scalar_select %p1961_p8, 1, 0 }
  0x12   : > { %s2302_s22 = scalar_select %p1965_p9, 1, 0 }
  0x13   : > { %s266_s24 = sshll.u32 %s1858_s23, 4  ;;  %p1660_p10 = pneg %p1965_p9  ;;  %s267_s24 = int_to_ptr.vmem [resolvable:$true] %s266_s24 }
  0x14   : > { %s295_s25 = sand.u32 1, %s1852_s13   ;;  %p1981_p13 = pnand %p1669_p11, %p1947_p4 }
  0x15   : > { %p1975_p12 = pnand %p1660_p10, %p1953_p5  ;;  %s1393_s28 = sshll.u32 %s295_s25, 7 }
  0x16   : > { %s2304_s27 = scalar_select %p1981_p13, 1, 0 }
  0x17   : > { %s1760_s10 = scalar_lea.hbm %s2286_s2, 16  ;;  %p1762_p1 = pneg %p1975_p12 }
  0x18   : > { %p1761_p0 = scmp.ne.s32.totalorder %s2286_s2, %s1760_s10  ;;  %p1767_p4 = scmp.lt.u32.totalorder %s1760_s10, %s2286_s2 }
  0x1a   : > { %p1763_p2 = pnand %p1762_p1, %p1761_p0 }
  0x1c   : > { %p1764_p3 = pneg %p1763_p2 }
  0x1e   : > { %p1769_p6 = pnand %p1767_p4, %p1764_p3 }
  0x20   : > { %1772 = shalt.err (!%p1769_p6)
}
  0x21   : > { %s1773_s23 = scalar_lea.vmem %s267_s24, 16  ;;  %s1780_s29 = scalar_lea.vmem %s267_s24, 32 }
  0x22   : > { %p1774_p7 = scmp.ne.s32.totalorder %s267_s24, %s1773_s23  ;;  %p1781_p5 = scmp.lt.s32.totalorder %s267_s24, %s267_s24 }
  0x23   : > { %p1782_p8 = scmp.lt.s32.totalorder %s1780_s29, %s1773_s23 }
  0x24   : > { %p1776_p10 = pnand %p1774_p7, %p1762_p1 }
  0x25   : > { %p1783_p9 = por %p1782_p8, %p1781_p5 }
  0x26   : > { %p1777_p11 = pneg %p1776_p10 }
  0x28   : > { %p1784_p13 = pnand %p1783_p9, %p1777_p11 }
  0x2a   : > { %1787 = shalt.err (!%p1784_p13)
}
  0x2b   : > { %1663 = dma.hbm_to_vmem [thread:$0]  (!%p1975_p12), %s2286_s2, 16, %s267_s24, [#allocation6]  }
  0x2c   : > { %s1471_s10 = sshll.u32 %s1856_s14, 11  ;;  %s299_s23 = scalar_lea.vmem [#allocation3], %s1393_s28 }
  0x2d   : > { %s2005_s19 = scalar_lea.hbm %s2284_s0, %s1471_s10  ;;  %s307_s29 = sshll.u32 %s299_s23, 4  ;;  %s2007_s29 = int_to_ptr.vmem [resolvable:$true] %s307_s29 }
  0x2e   : > { %s2009_s26 = scalar_lea.sflag [#allocation4], %s295_s25  ;;  %s1788_s30 = scalar_lea.hbm %s2005_s19, 2048 }
  0x2f   : > { %p1789_p5 = scmp.ne.s32.totalorder %s2005_s19, %s1788_s30  ;;  %p2305_p8 = scmp.ne.s32.totalorder %s2304_s27, 0 }
  0x30   : > { %s1793_s10 = scalar_lea.hbm %s2284_s0, 4096  ;;  %p1794_p0 = scmp.lt.u32.totalorder %s2005_s19, %s2284_s0 }
  0x31   : > { %p1790_p9 = pneg %p2305_p8  ;;  %p1795_p1 = scmp.lt.u32.totalorder %s1793_s10, %s1788_s30 }
  0x32   : > { %p1797_p3 = scmp.lt.u32.totalorder %s1788_s30, %s2005_s19 }
  0x33   : > { %p1791_p12 = pnand %p1790_p9, %p1789_p5  ;;  %p1796_p2 = por %p1795_p1, %p1794_p0 }
  0x35   : > { %p1792_p13 = pneg %p1791_p12  ;;  %p1798_p4 = por %p1797_p3, %p1796_p2 }
  0x37   : > { %p1799_p6 = pnand %p1798_p4, %p1792_p13 }
  0x39   : > { %1802 = shalt.err (!%p1799_p6)
}
  0x3a   : > { %s1803_s25 = scalar_lea.vmem %s2007_s29, 2048  ;;  %s1859_s28 = smov [#allocation3]  }
  0x3b   : > { %p1804_p7 = scmp.ne.s32.totalorder %s2007_s29, %s1803_s25  ;;  %s1808_s23 = sshll.u32 %s1859_s28, 4  ;;  %s1809_s23 = int_to_ptr.vmem [resolvable:$false] %s1808_s23 }
  0x3c   : > { %s1810_s24 = scalar_lea.vmem %s1809_s23, 4096  ;;  %p1811_p5 = scmp.lt.s32.totalorder %s2007_s29, %s1809_s23 }
  0x3d   : > { %p1806_p10 = pnand %p1804_p7, %p1790_p9  ;;  %p1812_p12 = scmp.lt.s32.totalorder %s1810_s24, %s1803_s25 }
  0x3f   : > { %p1807_p11 = pneg %p1806_p10  ;;  %p1813_p0 = por %p1812_p12, %p1811_p5 }
  0x41   : > { %p1814_p1 = pnand %p1813_p0, %p1807_p11 }
  0x43   : > { %1817 = shalt.err (!%p1814_p1)
}
  0x44   : > { %s1860_s30 = smov 128   ;;  %s1861_s11 = smov 8  }
  0x45   : > { %1667 = dma.hbm_to_vmem [thread:$0]  (!%p2305_p8), %s2005_s19, 2048, %s2007_s29, %s2009_s26, %s1860_s30, %s1860_s30, %s1861_s11  }
  0x46   : > { %p2306_p9 = scmp.ne.s32.totalorder %s2302_s22, 0 }
  0x47   : > { %s321_s10 = sand.u32 (!%p2306_p9), 1, %s1848_s12   ;;  %p2307_p13 = scmp.ne.s32.totalorder (!%p2306_p9), %s2301_s21, 0 }
  0x48   : > { %319 = sbr.rel (%p2306_p9) target bundleno = 1063 (0x427), region = 56  ;;  %s1398_s16 = sshll.u32 (!%p2306_p9), %s321_s10, 7 }
  0x49   : > { %s322_s17 = scalar_lea.sflag (!%p2306_p9), [#allocation4], %s321_s10  ;;  %s2040_s25 = scalar_lea.vmem (!%p2306_p9), [#allocation3], %s1398_s16 }
  0x4f   : > { %1835 = dma.done.wait (%p2307_p13), %s322_s17, 2048  }
  0x50   : > { %1837 = vsyncadd (%p2307_p13), %s322_s17, 4294965248  ;;  %p2308_p2 = scmp.ne.s32.totalorder %s2300_s20, 0 }
  0x52   : > { %1839 = dma.done.wait (%p2308_p2), [#allocation6], 16  }
  0x53   : > { %1841 = vsyncadd (%p2308_p2), [#allocation6], 4294967280  ;;  %v1706_v1 = vld [vmem:[%s2285_s1 + $0x40] sm:$0xff]   ;;  %v1708_v3 = vld [vmem:[%s2285_s1 + $0x48] sm:$0xff]   ;;  %vm987_vm0 = vcmask 523264   ;;  %vm1172_vm1 = vcmask 261120  }
  0x54   : > { %v1707_v2 = vld [vmem:[%s2285_s1] sm:$0xff]   ;;  %1472 = vmatprep.subr.bf16.mxu0 %v1706_v1  ;;  %v1709_v4 = vld [vmem:[%s2285_s1 + $0x8] sm:$0xff]   ;;  %v1710_v5 = vld [vmem:[%s2285_s1 + $0x50] sm:$0xff]   ;;  %s1400_s19 = sshll.u32 %s1388_s8, 4  ;;  %vm1294_vm2 = vcmask 7168  }
  0x55   : > { %1473 = vmatpush3.bf16.msra.mxu0 %v1707_v2  ;;  %v1711_v6 = vld [vmem:[%s2285_s1 + $0x10] sm:$0xff]   ;;  %v1712_v7 = vld [vmem:[%s2285_s1 + $0x58] sm:$0xff]   ;;  %v1714_v9 = vld [vmem:[%s2285_s1 + $0x60] sm:$0xff]   ;;  %p366_p8 = scmp.lt.s32.totalorder %s1400_s19, 31 }
  0x56   : > { %1474 = vmatprep.subr.bf16.mxu0 %v1708_v3  ;;  %v1713_v8 = vld [vmem:[%s2285_s1 + $0x18] sm:$0xff]   ;;  %v1715_v10 = vld [vmem:[%s2285_s1 + $0x20] sm:$0xff]   ;;  %v1716_v11 = vld [vmem:[%s2285_s1 + $0x68] sm:$0xff]  }
  0x57   : > { %v1724_v12 = vld [vmem:[%s2040_s25 + $0x4] ss:$8 sps:$4 sm:$0xff]   ;;  %v1720_v16 = vld [vmem:[%s2285_s1 + $0x78] sm:$0xff]   ;;  %v1722_v19 = vld [vmem:[%s2040_s25] ss:$8 sps:$4 sm:$0xff]   ;;  %s2314_s19 = smov (!%p366_p8, %s1400_s19), 31 }
  0x58   : > { %v1717_v13 = vld [vmem:[%s2285_s1 + $0x28] sm:$0xff]   ;;  %635 = vmatprep.mubr.bf16.mxu0 %v1724_v12  ;;  %v1718_v14 = vld [vmem:[%s2285_s1 + $0x70] sm:$0xff]   ;;  %v1721_v17 = vld [vmem:[%s2285_s1 + $0x38] sm:$0xff]   ;;  %s1401_s29 = sshll.u32 %s2314_s19, 3 }
  0x59   : > { %1475 = vmatpush3.bf16.msra.mxu0 %v1709_v4  ;;  %v1719_v15 = vld [vmem:[%s2285_s1 + $0x30] sm:$0xff]   ;;  %v1746_v18 = vld [vmem:[%s2287_s3] sm:$0xff]   ;;  %v1747_v20 = vld [vmem:[%s2287_s3 + $0x8] sm:$0xff]   ;;  %s2237_s21 = scalar_lea.vmem %s2293_s9, %s1401_s29 }
  0x5a   : > { %1476 = vmatprep.subr.bf16.mxu0 %v1710_v5  ;;  %v1725_v21 = vld [vmem:[%s2040_s25 + $0x14] ss:$8 sps:$4 sm:$0xff]   ;;  %1574 = vmatprep.subr.bf16.mxu1 %v1746_v18  ;;  %v1727_v23 = vld [vmem:[%s2040_s25 + $0x10] ss:$8 sps:$4 sm:$0xff]   ;;  %v1728_v24 = vld [vmem:[%s2040_s25 + $0x24] ss:$8 sps:$4 sm:$0xff]  }
  0x5b   : > { %v1748_v22 = vld [vmem:[%s2287_s3 + $0x10] sm:$0xff]   ;;  %1575 = vmatpush3.bf16.msra.mxu1 %v1746_v18  ;;  %v1730_v25 = vld [vmem:[%s2040_s25 + $0x20] ss:$8 sps:$4 sm:$0xff]   ;;  %v1749_v36 = vld [vmem:[%s2287_s3 + $0x18] sm:$0xff]  }
  0x5c   : > { %1576 = vmatprep.subr.bf16.mxu1 %v1747_v20  ;;  %v1731_v26 = vld [vmem:[%s2040_s25 + $0x34] ss:$8 sps:$4 sm:$0xff]   ;;  %v1733_v27 = vld [vmem:[%s2040_s25 + $0x30] ss:$8 sps:$4 sm:$0xff]   ;;  %v1734_v28 = vld [vmem:[%s2040_s25 + $0x44] ss:$8 sps:$4 sm:$0xff]  }
  0x5d   : > { %1477 = vmatpush3.bf16.msra.mxu0 %v1711_v6  ;;  %v1736_v29 = vld [vmem:[%s2040_s25 + $0x40] ss:$8 sps:$4 sm:$0xff]   ;;  %v1737_v30 = vld [vmem:[%s2040_s25 + $0x54] ss:$8 sps:$4 sm:$0xff]   ;;  %v1739_v31 = vld [vmem:[%s2040_s25 + $0x50] ss:$8 sps:$4 sm:$0xff]  }
  0x5e   : > { %1478 = vmatprep.subr.bf16.mxu0 %v1712_v7  ;;  %v1740_v32 = vld [vmem:[%s2040_s25 + $0x64] ss:$8 sps:$4 sm:$0xff]   ;;  %v1742_v33 = vld [vmem:[%s2040_s25 + $0x60] ss:$8 sps:$4 sm:$0xff]   ;;  %v1743_v34 = vld [vmem:[%s2040_s25 + $0x74] ss:$8 sps:$4 sm:$0xff]  }
  0x5f   : > { %1577 = vmatpush3.bf16.msra.mxu1 %v1747_v20  ;;  %v1745_v35 = vld [vmem:[%s2040_s25 + $0x70] ss:$8 sps:$4 sm:$0xff]   ;;  %v1750_v37 = vld [vmem:[%s2287_s3 + $0x20] sm:$0xff]   ;;  %v1751_v38 = vld [vmem:[%s2287_s3 + $0x28] sm:$0xff]  }
  0x60   : > { %1578 = vmatprep.subr.bf16.mxu1 %v1748_v22  ;;  %v1752_v39 = vld [vmem:[%s2287_s3 + $0x30] sm:$0xff]   ;;  %v1753_v40 = vld [vmem:[%s2287_s3 + $0x38] sm:$0xff]   ;;  %v1754_v41 = vld [vmem:[%s2289_s5] sm:$0xff]  }
  0x61   : > { %1479 = vmatpush3.bf16.msra.mxu0 %v1713_v8  ;;  %v2141_v43 = vld [vmem:[#allocation5] ss:$0 sm:$0xff] }
  0x62   : > { %1480 = vmatprep.subr.bf16.mxu0 %v1714_v9 }
  0x63   : > { %1579 = vmatpush3.bf16.msra.mxu1 %v1748_v22 }
  0x64   : > { %1580 = vmatprep.subr.bf16.mxu1 %v1749_v36 }
  0x65   : > { %1481 = vmatpush3.bf16.msra.mxu0 %v1715_v10 }
  0x66   : > { %1482 = vmatprep.subr.bf16.mxu0 %v1716_v11 }
  0x67   : > { %1581 = vmatpush3.bf16.msra.mxu1 %v1749_v36 }
  0x68   : > { %1582 = vmatprep.subr.bf16.mxu1 %v1750_v37 }
  0x69   : > { %1483 = vmatpush3.bf16.msra.mxu0 %v1717_v13 }
  0x6a   : > { %1484 = vmatprep.subr.bf16.mxu0 %v1718_v14 }
  0x6b   : > { %1583 = vmatpush3.bf16.msra.mxu1 %v1750_v37 }
  0x6c   : > { %1584 = vmatprep.subr.bf16.mxu1 %v1751_v38 }
  0x6d   : > { %1485 = vmatpush3.bf16.msra.mxu0 %v1719_v15 }
  0x6e   : > { %1486 = vmatprep.subr.bf16.mxu0 %v1720_v16 }
  0x6f   : > { %1585 = vmatpush3.bf16.msra.mxu1 %v1751_v38 }
  0x70   : > { %1586 = vmatprep.subr.bf16.mxu1 %v1752_v39 }
  0x71   : > { %1487 = vmatpush3.bf16.msra.mxu0 %v1721_v17 }
  0x73   : > { %1587 = vmatpush3.bf16.msra.mxu1 %v1752_v39 }
  0x74   : > { %636 = vmatmul.mubr.bf16.vlgmr.msra.gmra.mrb[0].mxu0 %v1722_v19  ;;  %1588 = vmatprep.subr.bf16.mxu1 %v1753_v40 }
  0x75   : > { %643 = vmatprep.mubr.bf16.mxu0 %v1725_v21 }
  0x77   : > { %1589 = vmatpush3.bf16.msra.mxu1 %v1753_v40 }
  0x78   : > { %1606 = vmatprep.subr.bf16.mxu1 %v1754_v41 }
  0x7c   : > { %644 = vmatmul.mubr.bf16.gmra.mrb[4].mxu0 %v1727_v23 }
  0x7d   : > { %651 = vmatprep.mubr.bf16.mxu0 %v1728_v24 }
  0x84   : > { %652 = vmatmul.mubr.bf16.gmra.mrb[8].mxu0 %v1730_v25 }
  0x85   : > { %659 = vmatprep.mubr.bf16.mxu0 %v1731_v26 }
  0x8c   : > { %660 = vmatmul.mubr.bf16.gmra.mrb[12].mxu0 %v1733_v27 }
  0x8d   : > { %667 = vmatprep.mubr.bf16.mxu0 %v1734_v28 }
  0x94   : > { %668 = vmatmul.mubr.bf16.gmra.mrb[16].mxu0 %v1736_v29 }
  0x95   : > { %675 = vmatprep.mubr.bf16.mxu0 %v1737_v30 }
  0x9c   : > { %676 = vmatmul.mubr.bf16.gmra.mrb[20].mxu0 %v1739_v31 }
  0x9d   : > { %683 = vmatprep.mubr.bf16.mxu0 %v1740_v32 }
  0xa4   : > { %684 = vmatmul.mubr.bf16.gmra.mrb[24].mxu0 %v1742_v33 }
  0xa5   : > { %691 = vmatprep.mubr.bf16.mxu0 %v1743_v34 }
  0xac   : > { %692 = vmatmul.mubr.bf16.gmra.mrb[28].mxu0 %v1745_v35 }
 0x147   : > { %v1488_v42 = vpop.f32.mrb[0].mxu0 }
 0x148   : > { %v1489_v44 = vpop.f32.mrb[1].mxu0 }
 0x149   : > { %v1490_v45 = vadd.f32 %v1489_v44, %v1488_v42  ;;  %v1491_v46 = vpop.f32.mrb[2].mxu0 }
 0x14a   : > { %v1492_v47 = vpop.f32.mrb[3].mxu0 }
 0x14b   : > { %v638_v48 = vadd.f32 %v1490_v45, %v2141_v43  ;;  %v1493_v49 = vadd.f32 %v1492_v47, %v1491_v46 }
 0x14d   : > { %v641_v50 = vadd.f32 %v1493_v49, %v2141_v43  ;;  %v700_v51 = vmul.f32 0.2, %v638_v48 }
 0x14f   : > { %v1494_v52 = vpop.f32.mrb[4].mxu0  ;;  %v701_v53 = vmul.f32 0.2, %v641_v50  ;;  %v716_v57 = vmax.f32 %v638_v48, %v700_v51 }
 0x150   : > { %v1495_v54 = vpop.f32.mrb[5].mxu0 }
 0x151   : > { %v1496_v55 = vadd.f32 %v1495_v54, %v1494_v52  ;;  %v1497_v56 = vpop.f32.mrb[6].mxu0  ;;  %v717_v58 = vmax.f32 %v641_v50, %v701_v53 }
 0x152   : > { %v1498_v59 = vpop.f32.mrb[7].mxu0 }
 0x153   : > { %v646_v60 = vadd.f32 %v1496_v55, %v2141_v43  ;;  %v1499_v61 = vadd.f32 %v1498_v59, %v1497_v56  ;;  %v732_v62 = vpack.c.bf16 %v717_v58, %v716_v57 }
 0x155   : > { %v702_v63 = vmul.f32 0.2, %v646_v60  ;;  %v649_v0 = vadd.f32 %v1499_v61, %v2141_v43  ;;  %1590 = vmatprep.mubr.bf16.mxu1 %v732_v62 }
 0x157   : > { %v703_v1 = vmul.f32 0.2, %v649_v0  ;;  %v1500_v2 = vpop.f32.mrb[8].mxu0  ;;  %v718_v4 = vmax.f32 %v646_v60, %v702_v63 }
 0x158   : > { %v1501_v3 = vpop.f32.mrb[9].mxu0 }
 0x159   : > { %v719_v5 = vmax.f32 %v649_v0, %v703_v1  ;;  %v1502_v6 = vadd.f32 %v1501_v3, %v1500_v2  ;;  %v1503_v7 = vpop.f32.mrb[10].mxu0 }
 0x15a   : > { %v1504_v8 = vpop.f32.mrb[11].mxu0 }
 0x15b   : > { %v654_v9 = vadd.f32 %v1502_v6, %v2141_v43  ;;  %v1505_v10 = vadd.f32 %v1504_v8, %v1503_v7  ;;  %v733_v11 = vpack.c.bf16 %v719_v5, %v718_v4 }
 0x15d   : > { %v704_v12 = vmul.f32 0.2, %v654_v9  ;;  %v657_v13 = vadd.f32 %v1505_v10, %v2141_v43  ;;  %1591 = vmatmul.mubr.bf16.vlgmr.msra.gmra.mrb[0].mxu1 %v733_v11 }
 0x15e   : > { %1607 = vmatpush3.bf16.msra.mxu1 %v1754_v41 }
 0x15f   : > { %v705_v14 = vmul.f32 0.2, %v657_v13  ;;  %v1506_v15 = vpop.f32.mrb[12].mxu0  ;;  %v720_v17 = vmax.f32 %v654_v9, %v704_v12 }
 0x160   : > { %v1507_v16 = vpop.f32.mrb[13].mxu0 }
 0x161   : > { %v721_v18 = vmax.f32 %v657_v13, %v705_v14  ;;  %v1508_v19 = vadd.f32 %v1507_v16, %v1506_v15  ;;  %v1509_v20 = vpop.f32.mrb[14].mxu0 }
 0x162   : > { %v1510_v21 = vpop.f32.mrb[15].mxu0 }
 0x163   : > { %v662_v22 = vadd.f32 %v1508_v19, %v2141_v43  ;;  %v1511_v23 = vadd.f32 %v1510_v21, %v1509_v20  ;;  %v734_v24 = vpack.c.bf16 %v721_v18, %v720_v17  ;;  %v1755_v20 = vld [vmem:[%s2289_s5 + $0x8] sm:$0xff]   ;;  %v1756_v21 = vld [vmem:[%s2289_s5 + $0x10] sm:$0xff]  }
 0x164   : > { %1608 = vmatprep.subr.bf16.mxu1 %v1755_v20 }
 0x165   : > { %v706_v25 = vmul.f32 0.2, %v662_v22  ;;  %v665_v26 = vadd.f32 %v1511_v23, %v2141_v43  ;;  %1594 = vmatprep.mubr.bf16.mxu1 %v734_v24  ;;  %1609 = vmatpush3.bf16.msra.mxu1 %v1755_v20  ;;  %v2174_v23 = vld [vmem:[%s2288_s4] ss:$0 sm:$0xff] }
 0x166   : > { %1610 = vmatprep.subr.bf16.mxu1 %v1756_v21 }
 0x167   : > { %v707_v27 = vmul.f32 0.2, %v665_v26  ;;  %v1512_v28 = vpop.f32.mrb[16].mxu0  ;;  %v722_v30 = vmax.f32 %v662_v22, %v706_v25  ;;  %v1758_v22 = vld [vmem:[%s2291_s7] sm:$0xff]  }
 0x168   : > { %v1513_v29 = vpop.f32.mrb[17].mxu0  ;;  %1630 = vmatprep.subr.bf16.mxu0 %v1758_v22 }
 0x169   : > { %v723_v31 = vmax.f32 %v665_v26, %v707_v27  ;;  %v1514_v32 = vadd.f32 %v1513_v29, %v1512_v28  ;;  %v1515_v33 = vpop.f32.mrb[18].mxu0  ;;  %1611 = vmatpush3.bf16.msra.mxu1 %v1756_v21  ;;  %1631 = vmatpush3.bf16.msra.mxu0 %v1758_v22 }
 0x16a   : > { %v1516_v34 = vpop.f32.mrb[19].mxu0 }
 0x16b   : > { %v670_v35 = vadd.f32 %v1514_v32, %v2141_v43  ;;  %v1517_v36 = vadd.f32 %v1516_v34, %v1515_v33  ;;  %v735_v37 = vpack.c.bf16 %v723_v31, %v722_v30 }
 0x16d   : > { %v708_v38 = vmul.f32 0.2, %v670_v35  ;;  %v673_v39 = vadd.f32 %v1517_v36, %v2141_v43  ;;  %1595 = vmatmul.mubr.bf16.gmra.mrb[4].mxu1 %v735_v37 }
 0x16f   : > { %v709_v40 = vmul.f32 0.2, %v673_v39  ;;  %v1518_v41 = vpop.f32.mrb[20].mxu0  ;;  %v724_v44 = vmax.f32 %v670_v35, %v708_v38 }
 0x170   : > { %v1519_v42 = vpop.f32.mrb[21].mxu0 }
 0x171   : > { %v725_v45 = vmax.f32 %v673_v39, %v709_v40  ;;  %v1520_v46 = vadd.f32 %v1519_v42, %v1518_v41  ;;  %v1521_v47 = vpop.f32.mrb[22].mxu0 }
 0x172   : > { %v1522_v48 = vpop.f32.mrb[23].mxu0 }
 0x173   : > { %v678_v49 = vadd.f32 %v1520_v46, %v2141_v43  ;;  %v1523_v50 = vadd.f32 %v1522_v48, %v1521_v47  ;;  %v736_v51 = vpack.c.bf16 %v725_v45, %v724_v44 }
 0x175   : > { %v710_v52 = vmul.f32 0.2, %v678_v49  ;;  %v681_v53 = vadd.f32 %v1523_v50, %v2141_v43  ;;  %1598 = vmatprep.mubr.bf16.mxu1 %v736_v51 }
 0x177   : > { %v711_v54 = vmul.f32 0.2, %v681_v53  ;;  %v1524_v55 = vpop.f32.mrb[24].mxu0  ;;  %v726_v57 = vmax.f32 %v678_v49, %v710_v52 }
 0x178   : > { %v1525_v56 = vpop.f32.mrb[25].mxu0 }
 0x179   : > { %v727_v58 = vmax.f32 %v681_v53, %v711_v54  ;;  %v1526_v59 = vadd.f32 %v1525_v56, %v1524_v55  ;;  %v1527_v60 = vpop.f32.mrb[26].mxu0 }
 0x17a   : > { %v1528_v61 = vpop.f32.mrb[27].mxu0 }
 0x17b   : > { %v686_v62 = vadd.f32 %v1526_v59, %v2141_v43  ;;  %v1529_v63 = vadd.f32 %v1528_v61, %v1527_v60  ;;  %v737_v0 = vpack.c.bf16 %v727_v58, %v726_v57 }
 0x17d   : > { %v712_v1 = vmul.f32 0.2, %v686_v62  ;;  %v689_v2 = vadd.f32 %v1529_v63, %v2141_v43  ;;  %1599 = vmatmul.mubr.bf16.gmra.mrb[8].mxu1 %v737_v0 }
 0x17f   : > { %v713_v3 = vmul.f32 0.2, %v689_v2  ;;  %v1530_v4 = vpop.f32.mrb[28].mxu0  ;;  %v728_v6 = vmax.f32 %v686_v62, %v712_v1 }
 0x180   : > { %v1531_v5 = vpop.f32.mrb[29].mxu0 }
 0x181   : > { %v729_v7 = vmax.f32 %v689_v2, %v713_v3  ;;  %v1532_v8 = vadd.f32 %v1531_v5, %v1530_v4  ;;  %v1533_v9 = vpop.f32.mrb[30].mxu0 }
 0x182   : > { %v1534_v10 = vpop.f32.mrb[31].mxu0 }
 0x183   : > { %v694_v11 = vadd.f32 %v1532_v8, %v2141_v43  ;;  %v1535_v12 = vadd.f32 %v1534_v10, %v1533_v9  ;;  %v738_v13 = vpack.c.bf16 %v729_v7, %v728_v6 }
 0x185   : > { %v714_v14 = vmul.f32 0.2, %v694_v11  ;;  %v697_v15 = vadd.f32 %v1535_v12, %v2141_v43  ;;  %1602 = vmatprep.mubr.bf16.mxu1 %v738_v13  ;;  %v1757_v43 = vld [vmem:[%s2289_s5 + $0x18] sm:$0xff]  }
 0x186   : > { %1612 = vmatprep.subr.bf16.mxu1 %v1757_v43 }
 0x187   : > { %v715_v16 = vmul.f32 0.2, %v697_v15  ;;  %v730_v17 = vmax.f32 %v694_v11, %v714_v14  ;;  %1613 = vmatpush3.bf16.msra.mxu1 %v1757_v43 }
 0x188   : > { %1650 = vmatprep.subr.bf16.mxu1 %v1758_v22 }
 0x189   : > { %v731_v18 = vmax.f32 %v697_v15, %v715_v16 }
 0x18b   : > { %v739_v19 = vpack.c.bf16 %v731_v18, %v730_v17 }
 0x18d   : > { %1603 = vmatmul.mubr.bf16.gmra.mrb[12].mxu1 %v739_v19 }
 0x230   : > { %v1592_v24 = vpop.f32.mrb[0].mxu1 }
 0x231   : > { %v854_v25 = vadd.f32 %v1592_v24, %v2174_v23  ;;  %v845_v26 = vpop.f32.mrb[1].mxu1 }
 0x232   : > { %v846_v27 = vadd.f32 %v2174_v23, %v845_v26  ;;  %v1593_v28 = vpop.f32.mrb[2].mxu1 }
 0x233   : > { %v910_v29 = vmul.f32 0.2, %v854_v25  ;;  %v857_v30 = vadd.f32 %v1593_v28, %v2174_v23  ;;  %v848_v31 = vpop.f32.mrb[3].mxu1 }
 0x234   : > { %v908_v32 = vmul.f32 0.2, %v846_v27  ;;  %v849_v33 = vadd.f32 %v2174_v23, %v848_v31 }
 0x235   : > { %v911_v34 = vmul.f32 0.2, %v857_v30  ;;  %v926_v36 = vmax.f32 %v854_v25, %v910_v29 }
 0x236   : > { %v909_v35 = vmul.f32 0.2, %v849_v33  ;;  %v924_v38 = vmax.f32 %v846_v27, %v908_v32 }
 0x237   : > { %v927_v37 = vmax.f32 %v857_v30, %v911_v34 }
 0x238   : > { %v925_v39 = vmax.f32 %v849_v33, %v909_v35  ;;  %v1759_v33 = vld [vmem:[%s2291_s7 + $0x8] sm:$0xff]  }
 0x239   : > { %v941_v40 = vpack.c.bf16 %v927_v37, %v926_v36  ;;  %1632 = vmatprep.subr.bf16.mxu0 %v1759_v33 }
 0x23a   : > { %v940_v41 = vpack.c.bf16 %v925_v39, %v924_v38  ;;  %1633 = vmatpush3.bf16.msra.mxu0 %v1759_v33 }
 0x23c   : > { %1614 = vmatprep.mubr.msk.bf16.mxu1 %vm987_vm0, %v940_v41 }
 0x23d   : > { %1615 = vmatmul.mubr.msk.bf16.vlgmr.msra.gmra.mrb[16].mxu1 %vm987_vm0, %v941_v40 }
 0x23e   : > { %1652 = vmatpush3.bf16.msra.mxu1 %v1758_v22 }
 0x23f   : > { %1651 = vmatprep.subr.bf16.mxu1 %v1759_v33 }
 0x240   : > { %v1596_v42 = vpop.f32.mrb[4].mxu1 }
 0x241   : > { %v870_v44 = vadd.f32 %v1596_v42, %v2174_v23  ;;  %v861_v45 = vpop.f32.mrb[5].mxu1 }
 0x242   : > { %v862_v46 = vadd.f32 %v2174_v23, %v861_v45  ;;  %v1597_v47 = vpop.f32.mrb[6].mxu1  ;;  %1653 = vmatpush3.bf16.msra.mxu1 %v1759_v33 }
 0x243   : > { %v914_v48 = vmul.f32 0.2, %v870_v44  ;;  %v873_v49 = vadd.f32 %v1597_v47, %v2174_v23  ;;  %v864_v50 = vpop.f32.mrb[7].mxu1 }
 0x244   : > { %v912_v51 = vmul.f32 0.2, %v862_v46  ;;  %v865_v52 = vadd.f32 %v2174_v23, %v864_v50 }
 0x245   : > { %v915_v53 = vmul.f32 0.2, %v873_v49  ;;  %v930_v55 = vmax.f32 %v870_v44, %v914_v48 }
 0x246   : > { %v913_v54 = vmul.f32 0.2, %v865_v52  ;;  %v928_v57 = vmax.f32 %v862_v46, %v912_v51 }
 0x247   : > { %v931_v56 = vmax.f32 %v873_v49, %v915_v53 }
 0x248   : > { %v929_v58 = vmax.f32 %v865_v52, %v913_v54 }
 0x249   : > { %v943_v59 = vpack.c.bf16 %v931_v56, %v930_v55 }
 0x24a   : > { %v942_v60 = vpack.c.bf16 %v929_v58, %v928_v57 }
 0x24c   : > { %1618 = vmatprep.mubr.msk.bf16.mxu1 %vm987_vm0, %v942_v60 }
 0x24d   : > { %1619 = vmatmul.mubr.msk.bf16.gmra.mrb[20].mxu1 %vm987_vm0, %v943_v59 }
 0x250   : > { %v1600_v61 = vpop.f32.mrb[8].mxu1 }
 0x251   : > { %v886_v62 = vadd.f32 %v1600_v61, %v2174_v23  ;;  %v877_v63 = vpop.f32.mrb[9].mxu1 }
 0x252   : > { %v878_v0 = vadd.f32 %v2174_v23, %v877_v63  ;;  %v1601_v1 = vpop.f32.mrb[10].mxu1 }
 0x253   : > { %v918_v2 = vmul.f32 0.2, %v886_v62  ;;  %v889_v3 = vadd.f32 %v1601_v1, %v2174_v23  ;;  %v880_v4 = vpop.f32.mrb[11].mxu1 }
 0x254   : > { %v916_v5 = vmul.f32 0.2, %v878_v0  ;;  %v881_v6 = vadd.f32 %v2174_v23, %v880_v4 }
 0x255   : > { %v919_v7 = vmul.f32 0.2, %v889_v3  ;;  %v934_v9 = vmax.f32 %v886_v62, %v918_v2 }
 0x256   : > { %v917_v8 = vmul.f32 0.2, %v881_v6  ;;  %v932_v11 = vmax.f32 %v878_v0, %v916_v5 }
 0x257   : > { %v935_v10 = vmax.f32 %v889_v3, %v919_v7 }
 0x258   : > { %v933_v12 = vmax.f32 %v881_v6, %v917_v8 }
 0x259   : > { %v945_v13 = vpack.c.bf16 %v935_v10, %v934_v9 }
 0x25a   : > { %v944_v14 = vpack.c.bf16 %v933_v12, %v932_v11 }
 0x25c   : > { %1622 = vmatprep.mubr.msk.bf16.mxu1 %vm987_vm0, %v944_v14 }
 0x25d   : > { %1623 = vmatmul.mubr.msk.bf16.gmra.mrb[24].mxu1 %vm987_vm0, %v945_v13 }
 0x260   : > { %v1604_v15 = vpop.f32.mrb[12].mxu1 }
 0x261   : > { %v902_v16 = vadd.f32 %v1604_v15, %v2174_v23  ;;  %v893_v17 = vpop.f32.mrb[13].mxu1 }
 0x262   : > { %v894_v18 = vadd.f32 %v2174_v23, %v893_v17  ;;  %v1605_v19 = vpop.f32.mrb[14].mxu1 }
 0x263   : > { %v922_v20 = vmul.f32 0.2, %v902_v16  ;;  %v905_v21 = vadd.f32 %v1605_v19, %v2174_v23  ;;  %v896_v43 = vpop.f32.mrb[15].mxu1 }
 0x264   : > { %v920_v22 = vmul.f32 0.2, %v894_v18  ;;  %v897_v24 = vadd.f32 %v2174_v23, %v896_v43  ;;  %v2206_v23 = vld [vmem:[%s2290_s6] ss:$0 sm:$0xff] }
 0x265   : > { %v923_v25 = vmul.f32 0.2, %v905_v21  ;;  %v938_v27 = vmax.f32 %v902_v16, %v922_v20 }
 0x266   : > { %v921_v26 = vmul.f32 0.2, %v897_v24  ;;  %v936_v29 = vmax.f32 %v894_v18, %v920_v22 }
 0x267   : > { %v939_v28 = vmax.f32 %v905_v21, %v923_v25 }
 0x268   : > { %v937_v30 = vmax.f32 %v897_v24, %v921_v26 }
 0x269   : > { %v947_v31 = vpack.c.bf16 %v939_v28, %v938_v27 }
 0x26a   : > { %v946_v32 = vpack.c.bf16 %v937_v30, %v936_v29 }
 0x26c   : > { %1626 = vmatprep.mubr.msk.bf16.mxu1 %vm987_vm0, %v946_v32 }
 0x26d   : > { %1627 = vmatmul.mubr.msk.bf16.gmra.mrb[28].mxu1 %vm987_vm0, %v947_v31 }
 0x310   : > { %v1616_v34 = vpop.f32.mrb[16].mxu1 }
 0x311   : > { %v1055_v35 = vadd.f32 %v1616_v34, %v2206_v23  ;;  %v1046_v36 = vpop.f32.mrb[17].mxu1 }
 0x312   : > { %v1047_v37 = vadd.f32 %v2206_v23, %v1046_v36  ;;  %v1617_v38 = vpop.f32.mrb[18].mxu1 }
 0x313   : > { %v1111_v39 = vmul.f32 0.2, %v1055_v35  ;;  %v1058_v40 = vadd.f32 %v1617_v38, %v2206_v23  ;;  %v1049_v41 = vpop.f32.mrb[19].mxu1 }
 0x314   : > { %v1109_v42 = vmul.f32 0.2, %v1047_v37  ;;  %v1050_v44 = vadd.f32 %v2206_v23, %v1049_v41 }
 0x315   : > { %v1112_v45 = vmul.f32 0.2, %v1058_v40  ;;  %v1127_v47 = vmax.f32 %v1055_v35, %v1111_v39 }
 0x316   : > { %v1110_v46 = vmul.f32 0.2, %v1050_v44  ;;  %v1125_v49 = vmax.f32 %v1047_v37, %v1109_v42 }
 0x317   : > { %v1128_v48 = vmax.f32 %v1058_v40, %v1112_v45 }
 0x318   : > { %v1126_v50 = vmax.f32 %v1050_v44, %v1110_v46  ;;  %v1457_v44 = vld [vmem:[#allocation2] ss:$0 sm:$0xff] }
 0x319   : > { %v1142_v51 = vpack.c.bf16 %v1128_v48, %v1127_v47 }
 0x31a   : > { %v1141_v52 = vpack.c.bf16 %v1126_v50, %v1125_v49 }
 0x31c   : > { %1634 = vmatprep.mubr.msk.bf16.mxu0 %vm1172_vm1, %v1141_v52 }
 0x31d   : > { %1635 = vmatmul.mubr.msk.bf16.vlgmr.msra.gmra.mrb[32].mxu0 %vm1172_vm1, %v1142_v51 }
 0x320   : > { %v1620_v53 = vpop.f32.mrb[20].mxu1 }
 0x321   : > { %v1071_v54 = vadd.f32 %v1620_v53, %v2206_v23  ;;  %v1062_v55 = vpop.f32.mrb[21].mxu1 }
 0x322   : > { %v1063_v56 = vadd.f32 %v2206_v23, %v1062_v55  ;;  %v1621_v57 = vpop.f32.mrb[22].mxu1 }
 0x323   : > { %v1115_v58 = vmul.f32 0.2, %v1071_v54  ;;  %v1074_v59 = vadd.f32 %v1621_v57, %v2206_v23  ;;  %v1065_v60 = vpop.f32.mrb[23].mxu1 }
 0x324   : > { %v1113_v61 = vmul.f32 0.2, %v1063_v56  ;;  %v1066_v62 = vadd.f32 %v2206_v23, %v1065_v60 }
 0x325   : > { %v1116_v63 = vmul.f32 0.2, %v1074_v59  ;;  %v1131_v1 = vmax.f32 %v1071_v54, %v1115_v58 }
 0x326   : > { %v1114_v0 = vmul.f32 0.2, %v1066_v62  ;;  %v1129_v3 = vmax.f32 %v1063_v56, %v1113_v61 }
 0x327   : > { %v1132_v2 = vmax.f32 %v1074_v59, %v1116_v63 }
 0x328   : > { %v1130_v4 = vmax.f32 %v1066_v62, %v1114_v0 }
 0x329   : > { %v1144_v5 = vpack.c.bf16 %v1132_v2, %v1131_v1 }
 0x32a   : > { %v1143_v6 = vpack.c.bf16 %v1130_v4, %v1129_v3 }
 0x32c   : > { %1638 = vmatprep.mubr.msk.bf16.mxu0 %vm1172_vm1, %v1143_v6 }
 0x32d   : > { %1639 = vmatmul.mubr.msk.bf16.gmra.mrb[36].mxu0 %vm1172_vm1, %v1144_v5 }
 0x330   : > { %v1624_v7 = vpop.f32.mrb[24].mxu1 }
 0x331   : > { %v1087_v8 = vadd.f32 %v1624_v7, %v2206_v23  ;;  %v1078_v9 = vpop.f32.mrb[25].mxu1 }
 0x332   : > { %v1079_v10 = vadd.f32 %v2206_v23, %v1078_v9  ;;  %v1625_v11 = vpop.f32.mrb[26].mxu1 }
 0x333   : > { %v1119_v12 = vmul.f32 0.2, %v1087_v8  ;;  %v1090_v13 = vadd.f32 %v1625_v11, %v2206_v23  ;;  %v1081_v14 = vpop.f32.mrb[27].mxu1 }
 0x334   : > { %v1117_v15 = vmul.f32 0.2, %v1079_v10  ;;  %v1082_v16 = vadd.f32 %v2206_v23, %v1081_v14 }
 0x335   : > { %v1120_v17 = vmul.f32 0.2, %v1090_v13  ;;  %v1135_v19 = vmax.f32 %v1087_v8, %v1119_v12 }
 0x336   : > { %v1118_v18 = vmul.f32 0.2, %v1082_v16  ;;  %v1133_v21 = vmax.f32 %v1079_v10, %v1117_v15 }
 0x337   : > { %v1136_v20 = vmax.f32 %v1090_v13, %v1120_v17 }
 0x338   : > { %v1134_v43 = vmax.f32 %v1082_v16, %v1118_v18 }
 0x339   : > { %v1146_v22 = vpack.c.bf16 %v1136_v20, %v1135_v19 }
 0x33a   : > { %v1145_v24 = vpack.c.bf16 %v1134_v43, %v1133_v21 }
 0x33c   : > { %1642 = vmatprep.mubr.msk.bf16.mxu1 %vm1172_vm1, %v1145_v24 }
 0x33d   : > { %1643 = vmatmul.mubr.msk.bf16.vlgmr.msra.gmra.mrb[32].mxu1 %vm1172_vm1, %v1146_v22 }
 0x340   : > { %v1628_v25 = vpop.f32.mrb[28].mxu1 }
 0x341   : > { %v1103_v26 = vadd.f32 %v1628_v25, %v2206_v23  ;;  %v1094_v27 = vpop.f32.mrb[29].mxu1 }
 0x342   : > { %v1095_v28 = vadd.f32 %v2206_v23, %v1094_v27  ;;  %v1629_v29 = vpop.f32.mrb[30].mxu1 }
 0x343   : > { %v1123_v30 = vmul.f32 0.2, %v1103_v26  ;;  %v1106_v31 = vadd.f32 %v1629_v29, %v2206_v23  ;;  %v1097_v32 = vpop.f32.mrb[31].mxu1 }
 0x344   : > { %v1121_v33 = vmul.f32 0.2, %v1095_v28  ;;  %v1098_v34 = vadd.f32 %v2206_v23, %v1097_v32 }
 0x345   : > { %v1124_v35 = vmul.f32 0.2, %v1106_v31  ;;  %v1139_v37 = vmax.f32 %v1103_v26, %v1123_v30 }
 0x346   : > { %v1122_v36 = vmul.f32 0.2, %v1098_v34  ;;  %v1137_v39 = vmax.f32 %v1095_v28, %v1121_v33 }
 0x347   : > { %v1140_v38 = vmax.f32 %v1106_v31, %v1124_v35 }
 0x348   : > { %v1138_v40 = vmax.f32 %v1098_v34, %v1122_v36 }
 0x349   : > { %v1148_v41 = vpack.c.bf16 %v1140_v38, %v1139_v37 }
 0x34a   : > { %v1147_v42 = vpack.c.bf16 %v1138_v40, %v1137_v39 }
 0x34c   : > { %1646 = vmatprep.mubr.msk.bf16.mxu1 %vm1172_vm1, %v1147_v42 }
 0x34d   : > { %1647 = vmatmul.mubr.msk.bf16.gmra.mrb[36].mxu1 %vm1172_vm1, %v1148_v41 }
 0x3f0   : > { %v1636_v23 = vpop.f32.mrb[32].mxu0 }
 0x3f1   : > { %v1240_v45 = vadd.f32 %v1636_v23, %v1457_v44  ;;  %v1231_v46 = vpop.f32.mrb[33].mxu0 }
 0x3f2   : > { %v1232_v47 = vadd.f32 %v1457_v44, %v1231_v46  ;;  %v1637_v48 = vpop.f32.mrb[34].mxu0 }
 0x3f3   : > { %1297 = vst.msk [vmem:[%s2237_s21 + $0x10] sm:$0xff] %vm1294_vm2, %v1240_v45  ;;  %v1243_v49 = vadd.f32 %v1637_v48, %v1457_v44  ;;  %v1234_v50 = vpop.f32.mrb[35].mxu0 }
 0x3f4   : > { %1295 = vst.msk [vmem:[%s2237_s21] sm:$0xff] %vm1294_vm2, %v1232_v47  ;;  %v1235_v51 = vadd.f32 %v1457_v44, %v1234_v50 }
 0x3f5   : > { %1298 = vst.msk [vmem:[%s2237_s21 + $0x18] sm:$0xff] %vm1294_vm2, %v1243_v49 }
 0x3f6   : > { %1296 = vst.msk [vmem:[%s2237_s21 + $0x8] sm:$0xff] %vm1294_vm2, %v1235_v51 }
 0x400   : > { %v1640_v52 = vpop.f32.mrb[36].mxu0 }
 0x401   : > { %v1256_v53 = vadd.f32 %v1640_v52, %v1457_v44  ;;  %v1247_v54 = vpop.f32.mrb[37].mxu0 }
 0x402   : > { %v1248_v55 = vadd.f32 %v1457_v44, %v1247_v54  ;;  %v1641_v56 = vpop.f32.mrb[38].mxu0 }
 0x403   : > { %1301 = vst.msk [vmem:[%s2237_s21 + $0x30] sm:$0xff] %vm1294_vm2, %v1256_v53  ;;  %v1259_v57 = vadd.f32 %v1641_v56, %v1457_v44  ;;  %v1250_v58 = vpop.f32.mrb[39].mxu0 }
 0x404   : > { %1299 = vst.msk [vmem:[%s2237_s21 + $0x20] sm:$0xff] %vm1294_vm2, %v1248_v55  ;;  %v1251_v59 = vadd.f32 %v1457_v44, %v1250_v58 }
 0x405   : > { %1302 = vst.msk [vmem:[%s2237_s21 + $0x38] sm:$0xff] %vm1294_vm2, %v1259_v57 }
 0x406   : > { %1300 = vst.msk [vmem:[%s2237_s21 + $0x28] sm:$0xff] %vm1294_vm2, %v1251_v59 }
 0x410   : > { %v1644_v60 = vpop.f32.mrb[32].mxu1 }
 0x411   : > { %v1272_v61 = vadd.f32 %v1644_v60, %v1457_v44  ;;  %v1263_v62 = vpop.f32.mrb[33].mxu1 }
 0x412   : > { %v1264_v63 = vadd.f32 %v1457_v44, %v1263_v62  ;;  %v1645_v0 = vpop.f32.mrb[34].mxu1 }
 0x413   : > { %1305 = vst.msk [vmem:[%s2237_s21 + $0x50] sm:$0xff] %vm1294_vm2, %v1272_v61  ;;  %v1275_v1 = vadd.f32 %v1645_v0, %v1457_v44  ;;  %v1266_v2 = vpop.f32.mrb[35].mxu1 }
 0x414   : > { %1303 = vst.msk [vmem:[%s2237_s21 + $0x40] sm:$0xff] %vm1294_vm2, %v1264_v63  ;;  %v1267_v3 = vadd.f32 %v1457_v44, %v1266_v2 }
 0x415   : > { %1306 = vst.msk [vmem:[%s2237_s21 + $0x58] sm:$0xff] %vm1294_vm2, %v1275_v1 }
 0x416   : > { %1304 = vst.msk [vmem:[%s2237_s21 + $0x48] sm:$0xff] %vm1294_vm2, %v1267_v3 }
 0x420   : > { %v1648_v4 = vpop.f32.mrb[36].mxu1 }
 0x421   : > { %v1288_v5 = vadd.f32 %v1648_v4, %v1457_v44  ;;  %v1279_v6 = vpop.f32.mrb[37].mxu1 }
 0x422   : > { %v1280_v7 = vadd.f32 %v1457_v44, %v1279_v6  ;;  %v1649_v8 = vpop.f32.mrb[38].mxu1 }
 0x423   : > { %1309 = vst.msk [vmem:[%s2237_s21 + $0x70] sm:$0xff] %vm1294_vm2, %v1288_v5  ;;  %v1291_v9 = vadd.f32 %v1649_v8, %v1457_v44  ;;  %v1282_v10 = vpop.f32.mrb[39].mxu1 }
 0x424   : > { %1307 = vst.msk [vmem:[%s2237_s21 + $0x60] sm:$0xff] %vm1294_vm2, %v1280_v7  ;;  %v1283_v11 = vadd.f32 %v1457_v44, %v1282_v10 }
 0x425   : > { %1310 = vst.msk [vmem:[%s2237_s21 + $0x78] sm:$0xff] %vm1294_vm2, %v1291_v9 }
 0x426   : > { %1308 = vst.msk [vmem:[%s2237_s21 + $0x68] sm:$0xff] %vm1294_vm2, %v1283_v11 }
 0x427 PF: > { %p22_p3 = scmp.ge.s32.totalorder %s1935_s15, 4   ;;  %s2309_s11 = smov %s1848_s12 }
 0x428   : > { %s2310_s12 = smov %s1852_s13  ;;  %s2311_s13 = smov %s1945_s18 }
 0x429   : > { %s2312_s14 = smov %s1935_s15  ;;  %24 = sbr.rel (!%p22_p3) target bundleno = 7 (0x7), region = 100 }
 0x430   :  { %1333 = vsyncpa [#allocation4], 1 }
 0x431   :  { %1335 = vsyncpa [#allocation4 + $0x1], 1 }
 0x432   :  { %1336 = vsyncpa [#allocation6], 1 }

</bundles_post_ra>
